<compile_context>
chip_gen: v7x
topology: tpu7x:2x2x1
jax: 0.10.0
libtpu: 0.0.40
codegen_flags: <defaults>
</compile_context>

<pallas_src>
import jax
import jax.numpy as jnp
from jax.experimental import pallas as pl
from jax.experimental.pallas import tpu as pltpu


def q_mlp_kernel(s_ref, a_ref, xn_ref,
                 w1s_ref, w1a_ref, w1x_ref, b1_ref,
                 w2_ref, b2_ref, w3_ref, b3_ref,
                 out_ref):
    # fc1 (normalization already folded into w1s/w1a/b1) + ReLU.
    h1 = jnp.dot(s_ref[...], w1s_ref[...], preferred_element_type=jnp.float32)
    h1 = h1 + jnp.dot(a_ref[...], w1a_ref[...], preferred_element_type=jnp.float32)
    h1 = h1 + jnp.dot(xn_ref[...], w1x_ref[...], preferred_element_type=jnp.float32)
    h1 = jnp.maximum(h1 + b1_ref[...], 0.0)
    # fc2 + ReLU.
    h2 = jnp.dot(h1, w2_ref[...], preferred_element_type=jnp.float32) + b2_ref[...]
    h2 = jnp.maximum(h2, 0.0)
    # fc3 (output dim = 2).
    out = jnp.dot(h2, w3_ref[...], preferred_element_type=jnp.float32) + b3_ref[...]
    out_ref[...] = out.astype(out_ref.dtype)


def xavier_uniform(key, fan_in, fan_out, gain=1.0):
    limit = gain * jnp.sqrt(6.0 / (fan_in + fan_out))
    return jax.random.uniform(key, (fan_in, fan_out), jnp.float32, -limit, limit)


def init_q_params(key, state_dim, action_dim, hidden_dim=256, xN_dim=2):
    in_dim = state_dim + action_dim + xN_dim
    k1, k2, k3 = jax.random.split(key, 3)
    return {
        "w1": xavier_uniform(k1, in_dim, hidden_dim),
        "b1": jnp.zeros((1, hidden_dim), jnp.float32),
        "w2": xavier_uniform(k2, hidden_dim, hidden_dim),
        "b2": jnp.zeros((1, hidden_dim), jnp.float32),
        "w3": xavier_uniform(k3, hidden_dim, 2),
        "b3": jnp.zeros((1, 2), jnp.float32),
    }


def _round_up(x, m):
    return ((x + m - 1) // m) * m


def q_forward(s, a, xN, params, xmean, xstd, *, state_dim, action_dim, block_b=1024):
    xn_dim = 2
    # Glue: reshape (matches torch .reshape(-1, dim)); NO concat is materialized.
    s2 = s.reshape(-1, state_dim).astype(jnp.float32)
    a2 = a.reshape(-1, action_dim).astype(jnp.float32)
    x2 = xN.reshape(-1, xn_dim).astype(jnp.float32)
    B = s2.shape[0]
    H = params["w1"].shape[1]
    sa = state_dim + action_dim

    # Fold normalization into fc1 (exact affine algebra):
    #   ((x - mean) / std) @ W = x @ (W * (1/std)[:, None]) - ((mean/std) @ W)
    inv_std = (1.0 / xstd.reshape(-1)).astype(jnp.float32)
    mean = xmean.reshape(-1).astype(jnp.float32)
    w1_sa = params["w1"][:sa, :]
    w1_sa_scaled = w1_sa * inv_std[:, None]
    b1_folded = params["b1"].reshape(1, H) - (mean * inv_std).reshape(1, sa) @ w1_sa
    w1s = w1_sa_scaled[:state_dim, :]
    w1a = w1_sa_scaled[state_dim:, :]
    w1x = params["w1"][sa:, :]

    # Batch tile: multiple of 8 sublanes; large tiles amortize per-step overhead.
    tb = max(8, min(block_b, _round_up(B, 8)))
    tb = _round_up(tb, 8)
    grid = (pl.cdiv(B, tb),)

    def row_spec(d):
        return pl.BlockSpec((tb, d), lambda i: (i, 0))

    def resident_spec(r, c):
        # Same block index every step -> weights stay resident in VMEM.
        return pl.BlockSpec((r, c), lambda i: (0, 0))

    out = pl.pallas_call(
        q_mlp_kernel,
        out_shape=jax.ShapeDtypeStruct((B, 2), jnp.float32),
        grid=grid,
        in_specs=[
            row_spec(state_dim),            # s
            row_spec(action_dim),           # a
            row_spec(xn_dim),               # xN
            resident_spec(state_dim, H),    # w1s (folded)
            resident_spec(action_dim, H),   # w1a (folded)
            resident_spec(xn_dim, H),       # w1x
            resident_spec(1, H),            # b1 (folded)
            resident_spec(H, H),            # w2
            resident_spec(1, H),            # b2
            resident_spec(H, 2),            # w3
            resident_spec(1, 2),            # b3
        ],
        out_specs=pl.BlockSpec((tb, 2), lambda i: (i, 0)),
        compiler_params=pltpu.CompilerParams(
            dimension_semantics=("parallel",)),
    )(s2, a2, x2, w1s, w1a, w1x, b1_folded,
      params["w2"], params["b2"], params["w3"], params["b3"])

    return out[:, 0], out[:, 1]


def q_forward_ref(s, a, xN, params, xmean, xstd, state_dim, action_dim):
    # Pure-JAX reference matching the torch module exactly.
    s2 = s.reshape(-1, state_dim)
    a2 = a.reshape(-1, action_dim)
    x = jnp.concatenate([s2, a2], axis=-1)
    x = (x - xmean.reshape(1, -1)) / xstd.reshape(1, -1)
    x = jnp.concatenate([x, xN.reshape(-1, 2)], axis=-1)
    x = jnp.maximum(x @ params["w1"] + params["b1"], 0.0)
    x = jnp.maximum(x @ params["w2"] + params["b2"], 0.0)
    x = x @ params["w3"] + params["b3"]
    return x[:, 0], x[:, 1]


if __name__ == "__main__":
    state_dim, action_dim, hidden_dim = 6, 2, 256
    batch = 16
    key = jax.random.PRNGKey(0)
    kp, ks, ka, kx, km, kn = jax.random.split(key, 6)

    params = init_q_params(kp, state_dim, action_dim, hidden_dim)
    xmean = jax.random.normal(km, (state_dim + action_dim,), jnp.float32)
    xstd = jnp.abs(jax.random.normal(kx, (state_dim + action_dim,), jnp.float32)) + 0.5

    s = jax.random.normal(ks, (batch, state_dim), jnp.float32)
    a = jax.random.normal(ka, (batch, action_dim), jnp.float32)
    xN = jax.random.normal(kn, (batch, 2), jnp.float32)

    q_fwd = jax.jit(q_forward,
                    static_argnames=("state_dim", "action_dim", "block_b"))
    # block_b=8 forces a 2-step grid at this tiny batch to exercise pipelining;
    # production default is block_b=1024.
    q1, q2 = q_fwd(s, a, xN, params, xmean, xstd,
                   state_dim=state_dim, action_dim=action_dim, block_b=8)
    jax.block_until_ready((q1, q2))

    r1, r2 = q_forward_ref(s, a, xN, params, xmean, xstd, state_dim, action_dim)
    assert q1.shape == (batch,) and q2.shape == (batch,)
    assert jnp.allclose(q1, r1, atol=1e-4, rtol=1e-4), float(jnp.max(jnp.abs(q1 - r1)))
    assert jnp.allclose(q2, r2, atol=1e-4, rtol=1e-4), float(jnp.max(jnp.abs(q2 - r2)))

    print("KERNEL_OK")
</pallas_src>

<mosaic_0001>
module attributes {stable_mosaic.version = 11 : i64} {
  func.func @q_mlp_kernel(%arg0: i32, %arg1: memref<8x6xf32, #tpu.memory_space<vmem>>, %arg2: memref<8x2xf32, #tpu.memory_space<vmem>>, %arg3: memref<8x2xf32, #tpu.memory_space<vmem>>, %arg4: memref<6x256xf32, #tpu.memory_space<vmem>>, %arg5: memref<2x256xf32, #tpu.memory_space<vmem>>, %arg6: memref<2x256xf32, #tpu.memory_space<vmem>>, %arg7: memref<1x256xf32, #tpu.memory_space<vmem>>, %arg8: memref<256x256xf32, #tpu.memory_space<vmem>>, %arg9: memref<1x256xf32, #tpu.memory_space<vmem>>, %arg10: memref<256x2xf32, #tpu.memory_space<vmem>>, %arg11: memref<1x2xf32, #tpu.memory_space<vmem>>, %arg12: memref<8x2xf32, #tpu.memory_space<vmem>>) attributes {dimension_semantics = [#tpu.dimension_semantics<parallel>], iteration_bounds = array<i64: 2>, scalar_prefetch = 0 : i64, scratch_operands = 0 : i64, tpu.core_type = #tpu.core_type<tc>, window_params = [{transform_indices = @transform_0, window_bounds = array<i64: 8, 6>}, {transform_indices = @transform_1, window_bounds = array<i64: 8, 2>}, {transform_indices = @transform_2, window_bounds = array<i64: 8, 2>}, {pipeline_mode = #tpu.pipeline_mode<synchronous>, transform_indices = @transform_3, window_bounds = array<i64: 6, 256>}, {pipeline_mode = #tpu.pipeline_mode<synchronous>, transform_indices = @transform_4, window_bounds = array<i64: 2, 256>}, {pipeline_mode = #tpu.pipeline_mode<synchronous>, transform_indices = @transform_5, window_bounds = array<i64: 2, 256>}, {pipeline_mode = #tpu.pipeline_mode<synchronous>, transform_indices = @transform_6, window_bounds = array<i64: 1, 256>}, {pipeline_mode = #tpu.pipeline_mode<synchronous>, transform_indices = @transform_7, window_bounds = array<i64: 256, 256>}, {pipeline_mode = #tpu.pipeline_mode<synchronous>, transform_indices = @transform_8, window_bounds = array<i64: 1, 256>}, {pipeline_mode = #tpu.pipeline_mode<synchronous>, transform_indices = @transform_9, window_bounds = array<i64: 256, 2>}, {pipeline_mode = #tpu.pipeline_mode<synchronous>, transform_indices = @transform_10, window_bounds = array<i64: 1, 2>}, {transform_indices = @transform_11, window_bounds = array<i64: 8, 2>}]} {
    %c0 = arith.constant 0 : index
    %c0_0 = arith.constant 0 : index
    %0 = vector.load %arg1[%c0, %c0_0] : memref<8x6xf32, #tpu.memory_space<vmem>>, vector<8x6xf32>
    %c0_1 = arith.constant 0 : index
    %c0_2 = arith.constant 0 : index
    %1 = vector.load %arg4[%c0_1, %c0_2] : memref<6x256xf32, #tpu.memory_space<vmem>>, vector<6x256xf32>
    %cst = arith.constant dense<0.000000e+00> : vector<8x256xf32>
    %2 = tpu.matmul %0, %1, %cst {dimension_numbers = #tpu.dot_dimension_numbers<[1], [0], [0], [1], [0, 0, 1, 1], [], []>} : vector<8x6xf32>, vector<6x256xf32>, vector<8x256xf32> -> vector<8x256xf32>
    %c0_3 = arith.constant 0 : index
    %c0_4 = arith.constant 0 : index
    %3 = vector.load %arg2[%c0_3, %c0_4] : memref<8x2xf32, #tpu.memory_space<vmem>>, vector<8x2xf32>
    %c0_5 = arith.constant 0 : index
    %c0_6 = arith.constant 0 : index
    %4 = vector.load %arg5[%c0_5, %c0_6] : memref<2x256xf32, #tpu.memory_space<vmem>>, vector<2x256xf32>
    %cst_7 = arith.constant dense<0.000000e+00> : vector<8x256xf32>
    %5 = tpu.matmul %3, %4, %cst_7 {dimension_numbers = #tpu.dot_dimension_numbers<[1], [0], [0], [1], [0, 0, 1, 1], [], []>} : vector<8x2xf32>, vector<2x256xf32>, vector<8x256xf32> -> vector<8x256xf32>
    %6 = arith.addf %2, %5 : vector<8x256xf32>
    %c0_8 = arith.constant 0 : index
    %c0_9 = arith.constant 0 : index
    %7 = vector.load %arg3[%c0_8, %c0_9] : memref<8x2xf32, #tpu.memory_space<vmem>>, vector<8x2xf32>
    %c0_10 = arith.constant 0 : index
    %c0_11 = arith.constant 0 : index
    %8 = vector.load %arg6[%c0_10, %c0_11] : memref<2x256xf32, #tpu.memory_space<vmem>>, vector<2x256xf32>
    %cst_12 = arith.constant dense<0.000000e+00> : vector<8x256xf32>
    %9 = tpu.matmul %7, %8, %cst_12 {dimension_numbers = #tpu.dot_dimension_numbers<[1], [0], [0], [1], [0, 0, 1, 1], [], []>} : vector<8x2xf32>, vector<2x256xf32>, vector<8x256xf32> -> vector<8x256xf32>
    %10 = arith.addf %6, %9 : vector<8x256xf32>
    %c0_13 = arith.constant 0 : index
    %c0_14 = arith.constant 0 : index
    %11 = vector.load %arg7[%c0_13, %c0_14] : memref<1x256xf32, #tpu.memory_space<vmem>>, vector<1x256xf32>
    %12 = vector.broadcast %11 : vector<1x256xf32> to vector<8x256xf32>
    %13 = arith.addf %10, %12 : vector<8x256xf32>
    %cst_15 = arith.constant 0.000000e+00 : f32
    %14 = vector.broadcast %cst_15 : f32 to vector<8x256xf32>
    %15 = arith.maximumf %13, %14 : vector<8x256xf32>
    %c0_16 = arith.constant 0 : index
    %c0_17 = arith.constant 0 : index
    %16 = vector.load %arg8[%c0_16, %c0_17] : memref<256x256xf32, #tpu.memory_space<vmem>>, vector<256x256xf32>
    %cst_18 = arith.constant dense<0.000000e+00> : vector<8x256xf32>
    %17 = tpu.matmul %15, %16, %cst_18 {dimension_numbers = #tpu.dot_dimension_numbers<[1], [0], [0], [1], [0, 0, 1, 1], [], []>} : vector<8x256xf32>, vector<256x256xf32>, vector<8x256xf32> -> vector<8x256xf32>
    %c0_19 = arith.constant 0 : index
    %c0_20 = arith.constant 0 : index
    %18 = vector.load %arg9[%c0_19, %c0_20] : memref<1x256xf32, #tpu.memory_space<vmem>>, vector<1x256xf32>
    %19 = vector.broadcast %18 : vector<1x256xf32> to vector<8x256xf32>
    %20 = arith.addf %17, %19 : vector<8x256xf32>
    %cst_21 = arith.constant 0.000000e+00 : f32
    %21 = vector.broadcast %cst_21 : f32 to vector<8x256xf32>
    %22 = arith.maximumf %20, %21 : vector<8x256xf32>
    %c0_22 = arith.constant 0 : index
    %c0_23 = arith.constant 0 : index
    %23 = vector.load %arg10[%c0_22, %c0_23] : memref<256x2xf32, #tpu.memory_space<vmem>>, vector<256x2xf32>
    %cst_24 = arith.constant dense<0.000000e+00> : vector<8x2xf32>
    %24 = tpu.matmul %22, %23, %cst_24 {dimension_numbers = #tpu.dot_dimension_numbers<[1], [0], [0], [1], [0, 0, 1, 1], [], []>} : vector<8x256xf32>, vector<256x2xf32>, vector<8x2xf32> -> vector<8x2xf32>
    %c0_25 = arith.constant 0 : index
    %c0_26 = arith.constant 0 : index
    %25 = vector.load %arg11[%c0_25, %c0_26] : memref<1x2xf32, #tpu.memory_space<vmem>>, vector<1x2xf32>
    %26 = vector.broadcast %25 : vector<1x2xf32> to vector<8x2xf32>
    %27 = arith.addf %24, %26 : vector<8x2xf32>
    %c0_27 = arith.constant 0 : index
    %c0_28 = arith.constant 0 : index
    %28 = vector.load %arg12[%c0_27, %c0_28] : memref<8x2xf32, #tpu.memory_space<vmem>>, vector<8x2xf32>
    tpu.vector_store %arg12[%c0_27, %c0_28], %27 {strides = array<i32>} : memref<8x2xf32, #tpu.memory_space<vmem>>, vector<8x2xf32>,
    return
  }
  func.func @transform_0(%arg0: i32) -> (i32, i32) {
    %c0_i32 = arith.constant 0 : i32
    %c0_i32_0 = arith.constant 0 : i32
    return %arg0, %c0_i32 : i32, i32
  }
  func.func @transform_1(%arg0: i32) -> (i32, i32) {
    %c0_i32 = arith.constant 0 : i32
    %c0_i32_0 = arith.constant 0 : i32
    return %arg0, %c0_i32 : i32, i32
  }
  func.func @transform_2(%arg0: i32) -> (i32, i32) {
    %c0_i32 = arith.constant 0 : i32
    %c0_i32_0 = arith.constant 0 : i32
    return %arg0, %c0_i32 : i32, i32
  }
  func.func @transform_3(%arg0: i32) -> (i32, i32) {
    %c0_i32 = arith.constant 0 : i32
    %c0_i32_0 = arith.constant 0 : i32
    %c0_i32_1 = arith.constant 0 : i32
    return %c0_i32, %c0_i32_0 : i32, i32
  }
  func.func @transform_4(%arg0: i32) -> (i32, i32) {
    %c0_i32 = arith.constant 0 : i32
    %c0_i32_0 = arith.constant 0 : i32
    %c0_i32_1 = arith.constant 0 : i32
    return %c0_i32, %c0_i32_0 : i32, i32
  }
  func.func @transform_5(%arg0: i32) -> (i32, i32) {
    %c0_i32 = arith.constant 0 : i32
    %c0_i32_0 = arith.constant 0 : i32
    %c0_i32_1 = arith.constant 0 : i32
    return %c0_i32, %c0_i32_0 : i32, i32
  }
  func.func @transform_6(%arg0: i32) -> (i32, i32) {
    %c0_i32 = arith.constant 0 : i32
    %c0_i32_0 = arith.constant 0 : i32
    %c0_i32_1 = arith.constant 0 : i32
    return %c0_i32, %c0_i32_0 : i32, i32
  }
  func.func @transform_7(%arg0: i32) -> (i32, i32) {
    %c0_i32 = arith.constant 0 : i32
    %c0_i32_0 = arith.constant 0 : i32
    %c0_i32_1 = arith.constant 0 : i32
    return %c0_i32, %c0_i32_0 : i32, i32
  }
  func.func @transform_8(%arg0: i32) -> (i32, i32) {
    %c0_i32 = arith.constant 0 : i32
    %c0_i32_0 = arith.constant 0 : i32
    %c0_i32_1 = arith.constant 0 : i32
    return %c0_i32, %c0_i32_0 : i32, i32
  }
  func.func @transform_9(%arg0: i32) -> (i32, i32) {
    %c0_i32 = arith.constant 0 : i32
    %c0_i32_0 = arith.constant 0 : i32
    %c0_i32_1 = arith.constant 0 : i32
    return %c0_i32, %c0_i32_0 : i32, i32
  }
  func.func @transform_10(%arg0: i32) -> (i32, i32) {
    %c0_i32 = arith.constant 0 : i32
    %c0_i32_0 = arith.constant 0 : i32
    %c0_i32_1 = arith.constant 0 : i32
    return %c0_i32, %c0_i32_0 : i32, i32
  }
  func.func @transform_11(%arg0: i32) -> (i32, i32) {
    %c0_i32 = arith.constant 0 : i32
    %c0_i32_0 = arith.constant 0 : i32
    return %arg0, %c0_i32 : i32, i32
  }
}

</mosaic_0001>

<bundles_post_ra>
// kernel: sub.1
= control target key start
LH: loop header
LB: loop body
LE: loop exit
PB: predicated region body
PF: predicated region fallthrough
CT: control target
= control target key end

     0   :  { %s56_s0 = inlined_call_operand.vmem [shape: f32[1,256], index: 0, kind: input, shape index: {}]   ;;  %s57_s1 = inlined_call_operand.vmem [shape: f32[1,256], index: 1, kind: input, shape index: {}]   ;;  %s58_s2 = inlined_call_operand.vmem [shape: f32[1,256], index: 2, kind: output, shape index: {}]  }
   0x1   :  { %v3_v0 = vld [vmem:[%s56_s0] sm:$0x1]  ;;  %v20_v2 = vld [vmem:[%s56_s0 + $0x1] sm:$0x1] }
   0x2   :  { %v4_v1 = vld [vmem:[%s57_s1] sm:$0x1]  ;;  %v21_v4 = vld [vmem:[%s57_s1 + $0x1] sm:$0x1] }
   0x3   :  { %v7_v3 = vsub.f32 %v3_v0, %v4_v1  ;;  %v16_v5 = vsub.f32 %v20_v2, %v21_v4 }
   0x5   :  { %9 = vst [vmem:[%s58_s2] sm:$0x1] %v7_v3  ;;  %22 = vst [vmem:[%s58_s2 + $0x1] sm:$0x1] %v16_v5 }

// kernel: q_forward.1
= control target key start
LH: loop header
LB: loop body
LE: loop exit
PB: predicated region body
PF: predicated region fallthrough
CT: control target
= control target key end

     0   :  { %16 = vsyncpa [#allocation3], 0  ;;  %s1348_s17 = smov 0   ;;  %s1542_s0 = inlined_call_operand.vmem [shape: f32[16,6], index: 0, kind: input, shape index: {}]   ;;  %s1543_s1 = inlined_call_operand.vmem [shape: f32[16,2], index: 1, kind: input, shape index: {}]   ;;  %s1544_s2 = inlined_call_operand.vmem [shape: f32[16,2], index: 2, kind: input, shape index: {}]   ;;  %s1545_s3 = inlined_call_operand.vmem [shape: f32[6,256], index: 3, kind: input, shape index: {}]   ;;  %s1546_s4 = inlined_call_operand.vmem [shape: f32[2,256], index: 4, kind: input, shape index: {}]   ;;  %s1547_s5 = inlined_call_operand.vmem [shape: f32[2,256], index: 5, kind: input, shape index: {}]   ;;  %s1548_s6 = inlined_call_operand.vmem [shape: f32[1,256], index: 6, kind: input, shape index: {}]   ;;  %s1549_s7 = inlined_call_operand.hbm [shape: f32[256,256], index: 7, kind: input, shape index: {}]   ;;  %s1550_s8 = inlined_call_operand.vmem [shape: f32[1,256], index: 8, kind: input, shape index: {}]   ;;  %s1551_s9 = inlined_call_operand.vmem [shape: f32[256,2], index: 9, kind: input, shape index: {}]   ;;  %s1552_s10 = inlined_call_operand.vmem [shape: f32[1,2], index: 10, kind: input, shape index: {}]   ;;  %s1553_s11 = inlined_call_operand.vmem [shape: f32[16,2], index: 11, kind: output, shape index: {}]  }
   0x1 LB: > { %s1354_s18 = sadd.s32 4294967295, %s1282_s17   ;;  %p1064_p0 = scmp.ge.s32.totalorder %s1282_s17, 1  ;;  %s1282_s17 = sphi %s1348_s17, %s22_s17  }
   0x2   : > { %p299_p1 = scmp.lt.s32.totalorder %s1282_s17, 3  ;;  %s1284_s19 = smov [#allocation2]  }
   0x3   : > { %s323_s20 = sshll.u32 %s1284_s19, 4  ;;  %p1554_p3 = scmp.eq.s32.totalorder %s1354_s18, 0  ;;  %s324_s20 = int_to_ptr.vmem [resolvable:$true] %s323_s20 }
   0x4   : > { %p1358_p2 = pnand %p1064_p0, %p299_p1  ;;  %s1244_s25 = scalar_lea.hbm %s1549_s7, 8192 }
   0x5   : > { %p1245_p6 = scmp.ne.s32.totalorder %s1549_s7, %s1244_s25  ;;  %p1251_p10 = scmp.lt.u32.totalorder %s1244_s25, %s1549_s7 }
   0x6   : > { %s1556_s21 = scalar_select %p1358_p2, 1, 0 }
   0x7   : > { %p1226_p4 = pneg %p1358_p2 }
   0x9   : > { %p1367_p5 = pnand %p1554_p3, %p1226_p4 }
   0xb   : > { %p1246_p7 = pneg %p1367_p5 }
   0xd   : > { %p1247_p8 = pnand %p1246_p7, %p1245_p6 }
   0xf   : > { %p1248_p9 = pneg %p1247_p8 }
  0x11   : > { %p1253_p11 = pnand %p1251_p10, %p1248_p9 }
  0x13   : > { %1256 = shalt.err (!%p1253_p11)
}
  0x14   : > { %s1257_s30 = scalar_lea.vmem %s324_s20, 8192  ;;  %p1265_p1 = scmp.lt.s32.totalorder %s324_s20, %s324_s20 }
  0x15   : > { %p1258_p12 = scmp.ne.s32.totalorder %s324_s20, %s1257_s30  ;;  %p1266_p4 = scmp.lt.s32.totalorder %s1257_s30, %s1257_s30 }
  0x17   : > { %p1260_p13 = pnand %p1258_p12, %p1246_p7  ;;  %p1267_p3 = por %p1266_p4, %p1265_p1 }
  0x19   : > { %p1261_p0 = pneg %p1260_p13 }
  0x1b   : > { %p1268_p2 = pnand %p1267_p3, %p1261_p0 }
  0x1d   : > { %1271 = shalt.err (!%p1268_p2)
}
  0x1e   : > { %s1285_s12 = smov 256   ;;  %s1286_s13 = smov 16  }
  0x1f   : > { %1229 = dma.hbm_to_vmem [thread:$0]  (!%p1367_p5), %s1549_s7, 8192, %s324_s20, [#allocation3], %s1285_s12, %s1285_s12, %s1286_s13  }
  0x20   : > { %p1558_p6 = scmp.ne.s32.totalorder %s1556_s21, 0 }
  0x21   : > { %p1559_p8 = scmp.eq.s32.totalorder (!%p1558_p6), %s1354_s18, 0 }
  0x22   : > { %369 = sbr.rel (%p1558_p6) target bundleno = 718 (0x2ce), region = 64 }
  0x29   : > { %1277 = dma.done.wait (%p1559_p8), [#allocation3], 8192   ;;  %p1560_p7 = pmov %p1559_p8 }
  0x2a   : > { %p415_p2 = scmp.lt.s32.totalorder %s1354_s18, 1  ;;  %v1287_v0 = vmov 0.0   ;;  %v1073_v1 = vld.sshfl [vmem:[%s1546_s4] sm:$0x33 pattern:$0x76325410] }
  0x2b   : > { %1279 = vsyncadd (%p1560_p7), [#allocation3], 4294959104  ;;  %518 = vmatprep.mubr.f32.mxu0 %v1287_v0  ;;  %vm449_vm0 = vcmask 1041408   ;;  %vm445_vm1 = vcmask 15360   ;;  %v444_v2 = vcombine.high %v1073_v1, %v1073_v1  ;;  %v433_v4 = vld [vmem:[%s1545_s3 + $0x8] sm:$0x3f] }
  0x2c   : > { %s1562_s18 = smov (!%p415_p2, %s1354_s18), 1  ;;  %vm529_vm2 = vcmask 1045504   ;;  %v432_v5 = vld [vmem:[%s1545_s3] sm:$0x3f]  ;;  %v715_v7 = vld [vmem:[#allocation2 + $0x8] sm:$0xff]  ;;  %v717_v8 = vld [vmem:[#allocation2 + $0x18] sm:$0xff] }
  0x2d   : > { %s1395_s16 = sshll.u32 %s1562_s18, 3  ;;  %v1080_v6 = vld.sshfl [vmem:[%s1547_s5] sm:$0x33 pattern:$0x76325410]  ;;  %1074 = vmatprep.subr.msk.mxu0 %vm449_vm0, %v444_v2  ;;  %v1122_v10 = vpack.c.bf16 %v717_v8, %v715_v7  ;;  %v716_v12 = vld [vmem:[#allocation2 + $0x10] sm:$0xff] }
  0x2e   : > { %s422_s21 = scalar_lea.vmem %s1543_s1, %s1395_s16  ;;  %v617_v9 = vcombine.high %v1080_v6, %v1080_v6  ;;  %v714_v11 = vld [vmem:[#allocation2] sm:$0xff]  ;;  %v719_v13 = vld [vmem:[#allocation2 + $0x28] sm:$0xff]  ;;  %1075 = vmatpush1.msk.msra.mxu0 %vm449_vm0, %v1073_v1  ;;  %v721_v15 = vld [vmem:[#allocation2 + $0x38] sm:$0xff]  ;;  %s418_s12 = scalar_lea.vmem %s1542_s0, %s1395_s16  ;;  %vm525_vm3 = vcmask 48128  }
  0x2f   : > { %v434_v3 = vld [vmem:[%s422_s21] sm:$0xff]  ;;  %v1124_v14 = vpack.c.bf16 %v716_v12, %v714_v11  ;;  %1077 = vmatprep.subr.msk.mxu0 %vm529_vm2, %v433_v4  ;;  %v1126_v16 = vpack.c.bf16 %v721_v15, %v719_v13  ;;  %v720_v18 = vld [vmem:[#allocation2 + $0x30] sm:$0xff]  ;;  %v723_v19 = vld [vmem:[#allocation2 + $0x48] sm:$0xff]  ;;  %1123 = vmatprep.subr.bf16.mxu1 %v1122_v10  ;;  %s426_s15 = scalar_lea.vmem %s1544_s2, %s1395_s16  ;;  %s430_s23 = scalar_lea.vmem %s1553_s11, %s1395_s16 }
  0x30   : > { %1076 = vmatmul.mubr.msk.f32.vlgmr.msra.gmra.mrb[0].mxu0 %vm445_vm1, %v434_v3  ;;  %v718_v17 = vld [vmem:[#allocation2 + $0x20] sm:$0xff]  ;;  %v725_v20 = vld [vmem:[#allocation2 + $0x58] sm:$0xff]  ;;  %v724_v24 = vld [vmem:[#allocation2 + $0x50] sm:$0xff] }
  0x31   : > { %1078 = vmatpush1.msk.msra.mxu0 %vm529_vm2, %v432_v5  ;;  %600 = vmatprep.mubr.f32.mxu0 %v1287_v0  ;;  %v1128_v21 = vpack.c.bf16 %v720_v18, %v718_v17  ;;  %v1130_v22 = vpack.c.bf16 %v725_v20, %v723_v19  ;;  %v722_v23 = vld [vmem:[#allocation2 + $0x40] sm:$0xff]  ;;  %v727_v26 = vld [vmem:[#allocation2 + $0x68] sm:$0xff]  ;;  %v729_v27 = vld [vmem:[#allocation2 + $0x78] sm:$0xff] }
  0x32   : > { %1081 = vmatprep.subr.msk.mxu0 %vm449_vm0, %v617_v9  ;;  %1125 = vmatpush1.bf16.msra.mxu1 %v1124_v14  ;;  %v431_v25 = vld [vmem:[%s418_s12] sm:$0xff]  ;;  %v1132_v28 = vpack.c.bf16 %v724_v24, %v722_v23  ;;  %v1134_v29 = vpack.c.bf16 %v729_v27, %v727_v26  ;;  %v728_v31 = vld [vmem:[#allocation2 + $0x70] sm:$0xff]  ;;  %v731_v32 = vld [vmem:[#allocation2 + $0x88] sm:$0xff] }
  0x33   : > { %1127 = vmatprep.subr.bf16.mxu1 %v1126_v16  ;;  %v726_v30 = vld [vmem:[#allocation2 + $0x60] sm:$0xff]  ;;  %v733_v33 = vld [vmem:[#allocation2 + $0x98] sm:$0xff]  ;;  %v732_v37 = vld [vmem:[#allocation2 + $0x90] sm:$0xff] }
  0x34   : > { %v1136_v34 = vpack.c.bf16 %v728_v31, %v726_v30  ;;  %v1138_v35 = vpack.c.bf16 %v733_v33, %v731_v32  ;;  %v730_v36 = vld [vmem:[#allocation2 + $0x80] sm:$0xff]  ;;  %v735_v39 = vld [vmem:[#allocation2 + $0xa8] sm:$0xff]  ;;  %v737_v40 = vld [vmem:[#allocation2 + $0xb8] sm:$0xff] }
  0x35   : > { %v607_v38 = vld [vmem:[%s426_s15] sm:$0xff]  ;;  %v1140_v41 = vpack.c.bf16 %v732_v37, %v730_v36  ;;  %v1142_v42 = vpack.c.bf16 %v737_v40, %v735_v39  ;;  %v736_v44 = vld [vmem:[#allocation2 + $0xb0] sm:$0xff]  ;;  %v739_v45 = vld [vmem:[#allocation2 + $0xc8] sm:$0xff] }
  0x36   : > { %1129 = vmatpush1.bf16.msra.mxu1 %v1128_v21  ;;  %v734_v43 = vld [vmem:[#allocation2 + $0xa0] sm:$0xff]  ;;  %v741_v46 = vld [vmem:[#allocation2 + $0xd8] sm:$0xff]  ;;  %v740_v50 = vld [vmem:[#allocation2 + $0xd0] sm:$0xff] }
  0x37   : > { %1131 = vmatprep.subr.bf16.mxu1 %v1130_v22  ;;  %v1144_v47 = vpack.c.bf16 %v736_v44, %v734_v43  ;;  %v1146_v48 = vpack.c.bf16 %v741_v46, %v739_v45  ;;  %v738_v49 = vld [vmem:[#allocation2 + $0xc0] sm:$0xff]  ;;  %v743_v51 = vld [vmem:[#allocation2 + $0xe8] sm:$0xff]  ;;  %v745_v52 = vld [vmem:[#allocation2 + $0xf8] sm:$0xff] }
  0x38   : > { %1079 = vmatmul.mubr.msk.f32.vlgmr.msra.gmra.mrb[0].mxu0 %vm525_vm3, %v431_v25  ;;  %v1148_v53 = vpack.c.bf16 %v740_v50, %v738_v49  ;;  %v1150_v54 = vpack.c.bf16 %v745_v52, %v743_v51  ;;  %v742_v55 = vld [vmem:[#allocation2 + $0xe0] sm:$0xff]  ;;  %v744_v56 = vld [vmem:[#allocation2 + $0xf0] sm:$0xff]  ;;  %v747_v57 = vld [vmem:[#allocation2 + $0x108] sm:$0xff] }
  0x39   : > { %1082 = vmatpush1.msk.msra.mxu0 %vm449_vm0, %v1080_v6  ;;  %689 = vmatprep.mubr.f32.mxu0 %v1287_v0  ;;  %v749_v58 = vld [vmem:[#allocation2 + $0x118] sm:$0xff]  ;;  %v1152_v59 = vpack.c.bf16 %v744_v56, %v742_v55  ;;  %v746_v61 = vld [vmem:[#allocation2 + $0x100] sm:$0xff]  ;;  %v748_v62 = vld [vmem:[#allocation2 + $0x110] sm:$0xff] }
  0x3a   : > { %1133 = vmatpush1.bf16.msra.mxu1 %v1132_v28  ;;  %v1154_v60 = vpack.c.bf16 %v749_v58, %v747_v57  ;;  %v751_v63 = vld [vmem:[#allocation2 + $0x128] sm:$0xff]  ;;  %v753_v0 = vld [vmem:[#allocation2 + $0x138] sm:$0xff]  ;;  %v1156_v1 = vpack.c.bf16 %v748_v62, %v746_v61  ;;  %v750_v3 = vld [vmem:[#allocation2 + $0x120] sm:$0xff] }
  0x3b   : > { %1135 = vmatprep.subr.bf16.mxu1 %v1134_v29  ;;  %v1158_v2 = vpack.c.bf16 %v753_v0, %v751_v63  ;;  %v752_v4 = vld [vmem:[#allocation2 + $0x130] sm:$0xff]  ;;  %v755_v5 = vld [vmem:[#allocation2 + $0x148] sm:$0xff]  ;;  %v757_v6 = vld [vmem:[#allocation2 + $0x158] sm:$0xff] }
  0x3c   : > { %v1160_v7 = vpack.c.bf16 %v752_v4, %v750_v3  ;;  %v1162_v8 = vpack.c.bf16 %v757_v6, %v755_v5  ;;  %v754_v9 = vld [vmem:[#allocation2 + $0x140] sm:$0xff]  ;;  %v756_v10 = vld [vmem:[#allocation2 + $0x150] sm:$0xff]  ;;  %v759_v11 = vld [vmem:[#allocation2 + $0x168] sm:$0xff] }
  0x3d   : > { %v761_v12 = vld [vmem:[#allocation2 + $0x178] sm:$0xff]  ;;  %v1164_v13 = vpack.c.bf16 %v756_v10, %v754_v9  ;;  %v758_v15 = vld [vmem:[#allocation2 + $0x160] sm:$0xff]  ;;  %v760_v16 = vld [vmem:[#allocation2 + $0x170] sm:$0xff] }
  0x3e   : > { %1137 = vmatpush1.bf16.msra.mxu1 %v1136_v34  ;;  %v1166_v14 = vpack.c.bf16 %v761_v12, %v759_v11  ;;  %v763_v17 = vld [vmem:[#allocation2 + $0x188] sm:$0xff]  ;;  %v765_v18 = vld [vmem:[#allocation2 + $0x198] sm:$0xff]  ;;  %v1168_v19 = vpack.c.bf16 %v760_v16, %v758_v15  ;;  %v762_v21 = vld [vmem:[#allocation2 + $0x180] sm:$0xff] }
  0x3f   : > { %1139 = vmatprep.subr.bf16.mxu1 %v1138_v35  ;;  %v1170_v20 = vpack.c.bf16 %v765_v18, %v763_v17  ;;  %v764_v22 = vld [vmem:[#allocation2 + $0x190] sm:$0xff]  ;;  %v767_v23 = vld [vmem:[#allocation2 + $0x1a8] sm:$0xff]  ;;  %v769_v24 = vld [vmem:[#allocation2 + $0x1b8] sm:$0xff]  ;;  %v700_v17 = vlaneseq }
  0x40   : > { %1083 = vmatmul.mubr.msk.f32.vlgmr.msra.gmra.mrb[0].mxu0 %vm445_vm1, %v607_v38  ;;  %v1172_v25 = vpack.c.bf16 %v764_v22, %v762_v21  ;;  %v1174_v26 = vpack.c.bf16 %v769_v24, %v767_v23  ;;  %v766_v27 = vld [vmem:[#allocation2 + $0x1a0] sm:$0xff]  ;;  %v768_v28 = vld [vmem:[#allocation2 + $0x1b0] sm:$0xff]  ;;  %v771_v29 = vld [vmem:[#allocation2 + $0x1c8] sm:$0xff] }
  0x41   : > { %v773_v30 = vld [vmem:[#allocation2 + $0x1d8] sm:$0xff]  ;;  %v1176_v31 = vpack.c.bf16 %v768_v28, %v766_v27  ;;  %v770_v33 = vld [vmem:[#allocation2 + $0x1c0] sm:$0xff]  ;;  %v772_v34 = vld [vmem:[#allocation2 + $0x1d0] sm:$0xff]  ;;  %v701_v18 = vshrl.u32 %v700_v17, 7 }
  0x42   : > { %1141 = vmatpush1.bf16.msra.mxu1 %v1140_v41  ;;  %v1178_v32 = vpack.c.bf16 %v773_v30, %v771_v29  ;;  %v1180_v35 = vpack.c.bf16 %v772_v34, %v770_v33  ;;  %v775_v36 = vld [vmem:[#allocation2 + $0x1e8] sm:$0xff]  ;;  %v777_v37 = vld [vmem:[#allocation2 + $0x1f8] sm:$0xff]  ;;  %v774_v39 = vld [vmem:[#allocation2 + $0x1e0] sm:$0xff] }
  0x43   : > { %1143 = vmatprep.subr.bf16.mxu1 %v1142_v42  ;;  %v1182_v38 = vpack.c.bf16 %v777_v37, %v775_v36  ;;  %v776_v40 = vld [vmem:[#allocation2 + $0x1f0] sm:$0xff]  ;;  %v879_v42 = vld [vmem:[%s1551_s9 + $0x80] sm:$0xff]  ;;  %v880_v43 = vld [vmem:[%s1551_s9 + $0x88] sm:$0xff]  ;;  %v706_v21 = vsub.s32 1, %v701_v18 }
  0x44   : > { %v1184_v41 = vpack.c.bf16 %v776_v40, %v774_v39  ;;  %v863_v44 = vld [vmem:[%s1551_s9] sm:$0xff]  ;;  %v1186_v45 = vpack.c.bf16 %v880_v43, %v879_v42  ;;  %v864_v46 = vld [vmem:[%s1551_s9 + $0x8] sm:$0xff]  ;;  %v865_v51 = vld [vmem:[%s1551_s9 + $0x10] sm:$0xff] }
  0x45   : > { %v1188_v49 = vpack.c.bf16 %v864_v46, %v863_v44  ;;  %v866_v52 = vld [vmem:[%s1551_s9 + $0x18] sm:$0xff]  ;;  %v867_v57 = vld [vmem:[%s1551_s9 + $0x20] sm:$0xff]  ;;  %v868_v58 = vld [vmem:[%s1551_s9 + $0x28] sm:$0xff] }
  0x46   : > { %1145 = vmatpush1.bf16.msra.mxu1 %v1144_v47  ;;  %v881_v47 = vld [vmem:[%s1551_s9 + $0x90] sm:$0xff]  ;;  %1187 = vmatprep.subr.bf16.mxu0 %v1186_v45  ;;  %v1192_v55 = vpack.c.bf16 %v866_v52, %v865_v51  ;;  %v1196_v61 = vpack.c.bf16 %v868_v58, %v867_v57  ;;  %v870_v0 = vld [vmem:[%s1551_s9 + $0x38] sm:$0xff]  ;;  %v871_v5 = vld [vmem:[%s1551_s9 + $0x40] sm:$0xff] }
  0x47   : > { %1147 = vmatprep.subr.bf16.mxu1 %v1146_v48  ;;  %v882_v48 = vld [vmem:[%s1551_s9 + $0x98] sm:$0xff]  ;;  %1189 = vmatpush3.bf16.msra.mxu0 %v1188_v49  ;;  %v869_v63 = vld [vmem:[%s1551_s9 + $0x30] sm:$0xff]  ;;  %v872_v6 = vld [vmem:[%s1551_s9 + $0x48] sm:$0xff] }
  0x48   : > { %v1190_v50 = vpack.c.bf16 %v882_v48, %v881_v47  ;;  %v1200_v3 = vpack.c.bf16 %v870_v0, %v869_v63  ;;  %v1204_v9 = vpack.c.bf16 %v872_v6, %v871_v5  ;;  %v873_v11 = vld [vmem:[%s1551_s9 + $0x50] sm:$0xff]  ;;  %v874_v12 = vld [vmem:[%s1551_s9 + $0x58] sm:$0xff]  ;;  %v875_v30 = vld [vmem:[%s1551_s9 + $0x60] sm:$0xff] }
  0x49   : > { %v1208_v15 = vpack.c.bf16 %v874_v12, %v873_v11  ;;  %v893_v33 = vld [vmem:[%s1551_s9 + $0xf0] sm:$0xff]  ;;  %v894_v34 = vld [vmem:[%s1551_s9 + $0xf8] sm:$0xff]  ;;  %v778_v39 = vld [vmem:[%s1550_s8] sm:$0x3] }
  0x4a   : > { %1149 = vmatpush1.bf16.msra.mxu1 %v1148_v53  ;;  %v883_v53 = vld [vmem:[%s1551_s9 + $0xa0] sm:$0xff]  ;;  %1191 = vmatprep.subr.bf16.mxu0 %v1190_v50  ;;  %v877_v36 = vld [vmem:[%s1551_s9 + $0x70] sm:$0xff]  ;;  %v878_v37 = vld [vmem:[%s1551_s9 + $0x78] sm:$0xff] }
  0x4b   : > { %1151 = vmatprep.subr.bf16.mxu1 %v1150_v54  ;;  %v884_v54 = vld [vmem:[%s1551_s9 + $0xa8] sm:$0xff]  ;;  %1193 = vmatpush3.bf16.msra.mxu0 %v1192_v55  ;;  %v1084_v49 = vld [vmem:[%s1552_s10] ss:$0 sm:$0xff] }
  0x4c   : > { %v1194_v56 = vpack.c.bf16 %v884_v54, %v883_v53 }
  0x4e   : > { %1153 = vmatpush1.bf16.msra.mxu1 %v1152_v59  ;;  %v885_v59 = vld [vmem:[%s1551_s9 + $0xb0] sm:$0xff]  ;;  %1195 = vmatprep.subr.bf16.mxu0 %v1194_v56 }
  0x4f   : > { %1155 = vmatprep.subr.bf16.mxu1 %v1154_v60  ;;  %v886_v60 = vld [vmem:[%s1551_s9 + $0xb8] sm:$0xff]  ;;  %1197 = vmatpush3.bf16.msra.mxu0 %v1196_v61 }
  0x50   : > { %v1198_v62 = vpack.c.bf16 %v886_v60, %v885_v59 }
  0x52   : > { %1157 = vmatpush1.bf16.msra.mxu1 %v1156_v1  ;;  %v887_v1 = vld [vmem:[%s1551_s9 + $0xc0] sm:$0xff]  ;;  %1199 = vmatprep.subr.bf16.mxu0 %v1198_v62 }
  0x53   : > { %1159 = vmatprep.subr.bf16.mxu1 %v1158_v2  ;;  %v888_v2 = vld [vmem:[%s1551_s9 + $0xc8] sm:$0xff]  ;;  %1201 = vmatpush3.bf16.msra.mxu0 %v1200_v3 }
  0x54   : > { %v1202_v4 = vpack.c.bf16 %v888_v2, %v887_v1 }
  0x56   : > { %1161 = vmatpush1.bf16.msra.mxu1 %v1160_v7  ;;  %v889_v7 = vld [vmem:[%s1551_s9 + $0xd0] sm:$0xff]  ;;  %1203 = vmatprep.subr.bf16.mxu0 %v1202_v4 }
  0x57   : > { %1163 = vmatprep.subr.bf16.mxu1 %v1162_v8  ;;  %v890_v8 = vld [vmem:[%s1551_s9 + $0xd8] sm:$0xff]  ;;  %1205 = vmatpush3.bf16.msra.mxu0 %v1204_v9 }
  0x58   : > { %v1206_v10 = vpack.c.bf16 %v890_v8, %v889_v7 }
  0x5a   : > { %1165 = vmatpush1.bf16.msra.mxu1 %v1164_v13  ;;  %v891_v13 = vld [vmem:[%s1551_s9 + $0xe0] sm:$0xff]  ;;  %1207 = vmatprep.subr.bf16.mxu0 %v1206_v10 }
  0x5b   : > { %1167 = vmatprep.subr.bf16.mxu1 %v1166_v14  ;;  %v892_v14 = vld [vmem:[%s1551_s9 + $0xe8] sm:$0xff]  ;;  %1209 = vmatpush3.bf16.msra.mxu0 %v1208_v15 }
  0x5c   : > { %v1210_v16 = vpack.c.bf16 %v892_v14, %v891_v13 }
  0x5e   : > { %1169 = vmatpush1.bf16.msra.mxu1 %v1168_v19  ;;  %1211 = vmatprep.subr.bf16.mxu0 %v1210_v16  ;;  %v702_v19 = vsub.s32 0, %v701_v18 }
  0x5f   : > { %1171 = vmatprep.subr.bf16.mxu1 %v1170_v20  ;;  %v698_v20 = vld [vmem:[%s1548_s6] sm:$0x3] }
  0x60   : > { %v703_v22 = vrot.slane %v698_v20, %v702_v19  ;;  %v707_v23 = vrot.slane %v698_v20, %v706_v21  ;;  %v783_v40 = vrot.slane %v778_v39, %v702_v19 }
  0x62   : > { %1173 = vmatpush1.bf16.msra.mxu1 %v1172_v25 }
  0x63   : > { %1175 = vmatprep.subr.bf16.mxu1 %v1174_v26 }
  0x66   : > { %1177 = vmatpush1.bf16.msra.mxu1 %v1176_v31  ;;  %v876_v31 = vld [vmem:[%s1551_s9 + $0x68] sm:$0xff] }
  0x67   : > { %1179 = vmatprep.subr.bf16.mxu1 %v1178_v32  ;;  %v1212_v32 = vpack.c.bf16 %v876_v31, %v875_v30 }
  0x69   : > { %1213 = vmatpush3.bf16.msra.mxu0 %v1212_v32 }
  0x6a   : > { %1181 = vmatpush1.bf16.msra.mxu1 %v1180_v35  ;;  %v1214_v35 = vpack.c.bf16 %v894_v34, %v893_v33 }
  0x6b   : > { %1183 = vmatprep.subr.bf16.mxu1 %v1182_v38  ;;  %v1216_v38 = vpack.c.bf16 %v878_v37, %v877_v36 }
  0x6c   : > { %1215 = vmatprep.subr.bf16.mxu0 %v1214_v35 }
  0x6d   : > { %1217 = vmatpush3.bf16.msra.mxu0 %v1216_v38 }
  0x6e   : > { %1185 = vmatpush1.bf16.msra.mxu1 %v1184_v41  ;;  %v787_v41 = vrot.slane %v778_v39, %v706_v21 }
 0x113   : > { %v691_v24 = vpop.f32.mrb[0].mxu0 }
 0x114   : > { %v710_v25 = vadd.f32 %v703_v22, %v691_v24  ;;  %v693_v26 = vpop.f32.mrb[1].mxu0 }
 0x115   : > { %v711_v27 = vadd.f32 %v707_v23, %v693_v26 }
 0x116   : > { %v712_v29 = vmax.f32 %v710_v25, 0.0 }
 0x117   : > { %v713_v28 = vmax.f32 %v711_v27, 0.0 }
 0x119   : > { %854 = vmatprep.mubr.f32.mxu1 %v713_v28 }
 0x11a   : > { %855 = vmatmul.mubr.f32.vlgmr.msra.gmra.mrb[0].mxu1 %v712_v29 }
 0x1ed   : > { %v856_v42 = vpop.f32.mrb[0].mxu1 }
 0x1ee   : > { %v857_v43 = vadd.f32 %v856_v42, %v783_v40  ;;  %v858_v44 = vpop.f32.mrb[1].mxu1 }
 0x1ef   : > { %v859_v45 = vadd.f32 %v858_v44, %v787_v41 }
 0x1f0   : > { %v861_v47 = vmax.f32 %v857_v43, 0.0 }
 0x1f1   : > { %v862_v46 = vmax.f32 %v859_v45, 0.0 }
 0x1f3   : > { %966 = vmatprep.mubr.f32.mxu0 %v862_v46 }
 0x1f4   : > { %967 = vmatmul.mubr.f32.vlgmr.msra.gmra.mrb[2].mxu0 %v861_v47 }
 0x2c7   : > { %v1119_v48 = vpop.f32.mrb[2].mxu0 }
 0x2c8   : > { %v1120_v50 = vpop.f32.mrb[3].mxu0 }
 0x2c9   : > { %v1121_v51 = vadd.f32 %v1120_v50, %v1119_v48 }
 0x2cb   : > { %v969_v52 = vadd.f32 %v1121_v51, %v1084_v49 }
 0x2cd   : > { %972 = vst.msk [vmem:[%s430_s23] sm:$0xff] %vm445_vm1, %v969_v52 }
 0x2ce PF: > { %s22_s17 = sadd.s32 1, %s1282_s17  }
 0x2cf   : > { %p19_p3 = scmp.ge.s32.totalorder %s22_s17, 4  }
 0x2d1   :  { %21 = sbr.rel (!%p19_p3) target bundleno = 1 (0x1), region = 105 }
 0x2d8   :  { %992 = vsyncpa [#allocation3], 1 }
 0x2d9   :  { %994 = vsyncpa [#allocation3 + $0x1], 1 }

</bundles_post_ra>
